<compile_context>
chip_gen: v5e
topology: v5e:2x2
jax: 0.10.0
libtpu: 0.0.40
codegen_flags: <defaults>
</compile_context>

<pallas_src>
import functools
import math

import jax
import jax.numpy as jnp
from jax.experimental import pallas as pl
from jax.experimental.pallas import tpu as pltpu

C_IN, C_MID, C_OUT = 64, 32, 16
BN_EPS = 1e-5
_DEFAULT_TILE_S = 16384          # ~4 MiB x-tile; DMA >> 0.35us/step overhead
_VMEM_LIMIT_BYTES = 48 << 20     # safe on v5e/v6e (128 MiB phys), headroom on v7x (64 MiB)


def _gelu(x, approx):
    if approx:
        # tanh-form GELU: tanh runs on the (otherwise idle) EUP slot, leaving
        # only a handful of VALU ops/element.  ~3e-4 abs deviation from
        # PyTorch's exact-erf nn.GELU(); preferred on v7x where the erf
        # polynomial becomes the binding VPU cost.
        c = jnp.float32(math.sqrt(2.0 / math.pi))
        return 0.5 * x * (1.0 + jnp.tanh(c * (x + 0.044715 * (x * x * x))))
    # PyTorch nn.GELU() default: exact erf form.
    return 0.5 * x * (1.0 + jax.lax.erf(x * jnp.float32(1.0 / math.sqrt(2.0))))


def _voxel_mlp(x, w1t, b1, w2t, b2, approx_gelu):
    # x: (64, L) -- channels on sublanes, spatial columns on lanes.
    h = jnp.dot(w1t, x, preferred_element_type=jnp.float32) + b1      # (32, L)
    h = _gelu(h, approx_gelu)
    y = jnp.dot(w2t, h, preferred_element_type=jnp.float32) + b2      # (16, L)
    return _gelu(y, approx_gelu)
    # TODO(synk): Dropout3d(0.1) is identity in eval mode; training-mode
    # channel dropout would need pltpu.prng_* + a per-channel (sublane) mask.


def _reduce_kernel_lanes(x_ref, w1t_ref, b1_ref, w2t_ref, b2_ref, o_ref,
                         *, approx_gelu):
    # Batch dim is pl.Squeezed(): x_ref (64, ts), o_ref (16, ts).
    o_ref[...] = _voxel_mlp(x_ref[...], w1t_ref[...], b1_ref[...],
                            w2t_ref[...], b2_ref[...],
                            approx_gelu).astype(o_ref.dtype)


def _reduce_kernel_batched(x_ref, w1t_ref, b1_ref, w2t_ref, b2_ref, o_ref,
                           *, approx_gelu):
    # Small-S path: x_ref (nb, 64, S), o_ref (nb, 16, S); static unroll over nb.
    for i in range(x_ref.shape[0]):
        o_ref[i] = _voxel_mlp(x_ref[i], w1t_ref[...], b1_ref[...],
                              w2t_ref[...], b2_ref[...],
                              approx_gelu).astype(o_ref.dtype)


def _fold_bn(w, b, gamma, beta, mean, var, eps=BN_EPS):
    """Fold inference-mode BatchNorm into a preceding 1x1x1 conv.

    w: (Cin, Cout) matmul weight, b: (Cout,) bias.  Returns folded (w, b).
    """
    scale = gamma / jnp.sqrt(var + eps)
    return w * scale[None, :], (b - mean) * scale + beta


def custom_channel_reduce(x, params, *, tile_s=_DEFAULT_TILE_S,
                          use_tanh_gelu=False):
    """x: (N, 64, D, H, W) float32 -> (N, 16, D, H, W) float32."""
    N, C, D, H, W = x.shape
    assert C == C_IN
    S = D * H * W

    # Fold BN into conv weights (plain-JAX glue on tiny tensors).
    w1, b1 = _fold_bn(params["w1"], params["b1"], params["g1"], params["be1"],
                      params["m1"], params["v1"])
    w2, b2 = _fold_bn(params["w2"], params["b2"], params["g2"], params["be2"],
                      params["m2"], params["v2"])
    # Channels-on-sublanes orientation: y = W^T @ x, bias broadcast over lanes.
    w1t = w1.T                      # (32, 64)
    w2t = w2.T                      # (16, 32)
    b1c = b1.reshape(C_MID, 1)      # (32, 1)
    b2c = b2.reshape(C_OUT, 1)      # (16, 1)

    # Native-layout view: (N, 64, S).  Pure reshape, no data movement.
    x3 = x.reshape(N, C_IN, S)

    cost = pl.CostEstimate(
        flops=2 * N * S * (C_IN * C_MID + C_MID * C_OUT),
        transcendentals=N * S * (C_MID + C_OUT),
        bytes_accessed=4 * (N * S * (C_IN + C_OUT)
                            + C_IN * C_MID + C_MID + C_MID * C_OUT + C_OUT),
    )

    if S >= 128:
        # Lane-tiled path: wide spatial axis on lanes, one batch elem per step.
        if S <= tile_s:
            ts = S                                   # full-dim block is legal
        else:
            ts = max(128, (tile_s // 128) * 128)     # lane-aligned tile
        ns = pl.cdiv(S, ts)
        # Keep >=2 parallel grid blocks so neither v7x TensorCore idles.
        if N == 1 and ns == 1 and S > 128:
            ts = max(128, ((pl.cdiv(S, 2) + 127) // 128) * 128)
            ns = pl.cdiv(S, ts)
        grid = (N, ns)
        kernel = functools.partial(_reduce_kernel_lanes,
                                   approx_gelu=use_tanh_gelu)
        in_specs = [
            pl.BlockSpec((pl.Squeezed(), C_IN, ts), lambda n, s: (n, 0, s)),
            pl.BlockSpec((C_MID, C_IN), lambda n, s: (0, 0)),   # w1^T (resident)
            pl.BlockSpec((C_MID, 1), lambda n, s: (0, 0)),      # b1
            pl.BlockSpec((C_OUT, C_MID), lambda n, s: (0, 0)),  # w2^T (resident)
            pl.BlockSpec((C_OUT, 1), lambda n, s: (0, 0)),      # b2
        ]
        out_spec = pl.BlockSpec((pl.Squeezed(), C_OUT, ts),
                                lambda n, s: (n, 0, s))
        dim_sem = ("parallel", "parallel")
    else:
        # Small-S path (lane width < 128): pack several batch elements per
        # grid step so the fixed per-step cost is amortized.  Last two block
        # dims equal the full array dims, so (8,128) alignment is satisfied.
        nb = min(N, 8)
        grid = (pl.cdiv(N, nb),)
        kernel = functools.partial(_reduce_kernel_batched,
                                   approx_gelu=use_tanh_gelu)
        in_specs = [
            pl.BlockSpec((nb, C_IN, S), lambda b: (b, 0, 0)),
            pl.BlockSpec((C_MID, C_IN), lambda b: (0, 0)),
            pl.BlockSpec((C_MID, 1), lambda b: (0, 0)),
            pl.BlockSpec((C_OUT, C_MID), lambda b: (0, 0)),
            pl.BlockSpec((C_OUT, 1), lambda b: (0, 0)),
        ]
        out_spec = pl.BlockSpec((nb, C_OUT, S), lambda b: (b, 0, 0))
        dim_sem = ("parallel",)

    out = pl.pallas_call(
        kernel,
        out_shape=jax.ShapeDtypeStruct((N, C_OUT, S), jnp.float32),
        grid_spec=pltpu.PrefetchScalarGridSpec(
            num_scalar_prefetch=0,
            grid=grid,
            in_specs=in_specs,
            out_specs=out_spec,
        ),
        compiler_params=pltpu.CompilerParams(
            dimension_semantics=dim_sem,
            vmem_limit_bytes=_VMEM_LIMIT_BYTES),
        cost_estimate=cost,
    )(x3, w1t, b1c, w2t, b2c)

    return out.reshape(N, C_OUT, D, H, W)   # already NCDHW; no transpose


def init_params(key):
    """Deterministic init matching PyTorch module shapes.

    Conv3d(64,32,1): weight (32,64,1,1,1) -> stored as matmul weight (64,32).
    Conv3d(32,16,1): weight (16,32,1,1,1) -> stored as (32,16).
    BatchNorm defaults: gamma=1, beta=0, running_mean=0, running_var=1.
    """
    k1, k2, k3, k4 = jax.random.split(key, 4)
    bnd1 = 1.0 / math.sqrt(C_IN)
    bnd2 = 1.0 / math.sqrt(C_MID)
    return {
        "w1": jax.random.uniform(k1, (C_IN, C_MID), jnp.float32, -bnd1, bnd1),
        "b1": jax.random.uniform(k2, (C_MID,), jnp.float32, -bnd1, bnd1),
        "g1": jnp.ones((C_MID,), jnp.float32),
        "be1": jnp.zeros((C_MID,), jnp.float32),
        "m1": jnp.zeros((C_MID,), jnp.float32),
        "v1": jnp.ones((C_MID,), jnp.float32),
        "w2": jax.random.uniform(k3, (C_MID, C_OUT), jnp.float32, -bnd2, bnd2),
        "b2": jax.random.uniform(k4, (C_OUT,), jnp.float32, -bnd2, bnd2),
        "g2": jnp.ones((C_OUT,), jnp.float32),
        "be2": jnp.zeros((C_OUT,), jnp.float32),
        "m2": jnp.zeros((C_OUT,), jnp.float32),
        "v2": jnp.ones((C_OUT,), jnp.float32),
    }


def _reference(x, params, use_tanh_gelu=False):
    """Pure-JAX reference."""
    w1, b1 = _fold_bn(params["w1"], params["b1"], params["g1"], params["be1"],
                      params["m1"], params["v1"])
    w2, b2 = _fold_bn(params["w2"], params["b2"], params["g2"], params["be2"],
                      params["m2"], params["v2"])
    xf = jnp.transpose(x, (0, 2, 3, 4, 1))
    h = _gelu(xf @ w1 + b1, use_tanh_gelu)
    y = _gelu(h @ w2 + b2, use_tanh_gelu)
    return jnp.transpose(y, (0, 4, 1, 2, 3))


if __name__ == "__main__":
    key = jax.random.PRNGKey(0)
    pkey, xkey1, xkey2 = jax.random.split(key, 3)
    params = init_params(pkey)

    # Case 1: tiny spatial volume (S = 32 < 128) -> batched small-S path.
    x_small = jax.random.normal(xkey1, (2, 64, 2, 4, 4), jnp.float32)
    out_small = jax.block_until_ready(custom_channel_reduce(x_small, params))
    ref_small = _reference(x_small, params)
    assert out_small.shape == (2, 16, 2, 4, 4), out_small.shape
    assert jnp.allclose(out_small, ref_small, atol=1e-4, rtol=1e-4), \
        "small-S mismatch vs reference"

    # Case 2: volumetric shape (S = 2048) -> lane-tiled path; N == 1 forces the
    # split into 2 spatial tiles so both v7x TensorCores get a block.
    x_vol = jax.random.normal(xkey2, (1, 64, 8, 16, 16), jnp.float32)
    out_vol = jax.block_until_ready(custom_channel_reduce(x_vol, params))
    ref_vol = _reference(x_vol, params)
    assert out_vol.shape == (1, 16, 8, 16, 16), out_vol.shape
    assert jnp.allclose(out_vol, ref_vol, atol=1e-4, rtol=1e-4), \
        "lane-tiled mismatch vs reference"

    # Case 3: tanh-GELU fast path (v7x VALU relief), validated against the
    # matching tanh reference at tight tolerance (numerics differ ~3e-4 from
    # PyTorch's exact erf, so it is opt-in).
    out_tanh = jax.block_until_ready(
        custom_channel_reduce(x_vol, params, use_tanh_gelu=True))
    ref_tanh = _reference(x_vol, params, use_tanh_gelu=True)
    assert jnp.allclose(out_tanh, ref_tanh, atol=1e-4, rtol=1e-4), \
        "tanh-GELU mismatch vs tanh reference"

    print("KERNEL_OK")
</pallas_src>

<mosaic_0001>
module attributes {stable_mosaic.version = 11 : i64} {
  func.func @_reduce_kernel_batched(%arg0: i32, %arg1: memref<2x64x32xf32, #tpu.memory_space<vmem>>, %arg2: memref<32x64xf32, #tpu.memory_space<vmem>>, %arg3: memref<32x1xf32, #tpu.memory_space<vmem>>, %arg4: memref<16x32xf32, #tpu.memory_space<vmem>>, %arg5: memref<16x1xf32, #tpu.memory_space<vmem>>, %arg6: memref<2x16x32xf32, #tpu.memory_space<vmem>>) attributes {dimension_semantics = [#tpu.dimension_semantics<parallel>], iteration_bounds = array<i64: 1>, scalar_prefetch = 0 : i64, scratch_operands = 0 : i64, tpu.core_type = #tpu.core_type<tc>, window_params = [{transform_indices = @transform_0, window_bounds = array<i64: 2, 64, 32>}, {pipeline_mode = #tpu.pipeline_mode<synchronous>, transform_indices = @transform_1, window_bounds = array<i64: 32, 64>}, {pipeline_mode = #tpu.pipeline_mode<synchronous>, transform_indices = @transform_2, window_bounds = array<i64: 32, 1>}, {pipeline_mode = #tpu.pipeline_mode<synchronous>, transform_indices = @transform_3, window_bounds = array<i64: 16, 32>}, {pipeline_mode = #tpu.pipeline_mode<synchronous>, transform_indices = @transform_4, window_bounds = array<i64: 16, 1>}, {transform_indices = @transform_5, window_bounds = array<i64: 2, 16, 32>}]} {
    %c0 = arith.constant 0 : index
    %c0_0 = arith.constant 0 : index
    %c0_1 = arith.constant 0 : index
    %0 = vector.load %arg1[%c0, %c0_0, %c0_1] : memref<2x64x32xf32, #tpu.memory_space<vmem>>, vector<1x64x32xf32>
    %1 = vector.shape_cast %0 : vector<1x64x32xf32> to vector<64x32xf32>
    %c0_2 = arith.constant 0 : index
    %c0_3 = arith.constant 0 : index
    %2 = vector.load %arg2[%c0_2, %c0_3] : memref<32x64xf32, #tpu.memory_space<vmem>>, vector<32x64xf32>
    %c0_4 = arith.constant 0 : index
    %c0_5 = arith.constant 0 : index
    %3 = vector.load %arg3[%c0_4, %c0_5] : memref<32x1xf32, #tpu.memory_space<vmem>>, vector<32x1xf32>
    %c0_6 = arith.constant 0 : index
    %c0_7 = arith.constant 0 : index
    %4 = vector.load %arg4[%c0_6, %c0_7] : memref<16x32xf32, #tpu.memory_space<vmem>>, vector<16x32xf32>
    %c0_8 = arith.constant 0 : index
    %c0_9 = arith.constant 0 : index
    %5 = vector.load %arg5[%c0_8, %c0_9] : memref<16x1xf32, #tpu.memory_space<vmem>>, vector<16x1xf32>
    %cst = arith.constant dense<0.000000e+00> : vector<32x32xf32>
    %6 = tpu.matmul %2, %1, %cst {dimension_numbers = #tpu.dot_dimension_numbers<[1], [0], [0], [1], [0, 0, 1, 1], [], []>} : vector<32x64xf32>, vector<64x32xf32>, vector<32x32xf32> -> vector<32x32xf32>
    %7 = vector.broadcast %3 : vector<32x1xf32> to vector<32x32xf32>
    %8 = arith.addf %6, %7 : vector<32x32xf32>
    %cst_10 = arith.constant 5.000000e-01 : f32
    %9 = vector.broadcast %cst_10 : f32 to vector<32x32xf32>
    %10 = arith.mulf %9, %8 : vector<32x32xf32>
    %cst_11 = arith.constant 0.707106769 : f32
    %11 = vector.broadcast %cst_11 : f32 to vector<32x32xf32>
    %12 = arith.mulf %8, %11 : vector<32x32xf32>
    %13 = math.erf %12 : vector<32x32xf32>
    %cst_12 = arith.constant 1.000000e+00 : f32
    %14 = vector.broadcast %cst_12 : f32 to vector<32x32xf32>
    %15 = arith.addf %14, %13 : vector<32x32xf32>
    %16 = arith.mulf %10, %15 : vector<32x32xf32>
    %cst_13 = arith.constant dense<0.000000e+00> : vector<16x32xf32>
    %17 = tpu.matmul %4, %16, %cst_13 {dimension_numbers = #tpu.dot_dimension_numbers<[1], [0], [0], [1], [0, 0, 1, 1], [], []>} : vector<16x32xf32>, vector<32x32xf32>, vector<16x32xf32> -> vector<16x32xf32>
    %18 = vector.broadcast %5 : vector<16x1xf32> to vector<16x32xf32>
    %19 = arith.addf %17, %18 : vector<16x32xf32>
    %cst_14 = arith.constant 5.000000e-01 : f32
    %20 = vector.broadcast %cst_14 : f32 to vector<16x32xf32>
    %21 = arith.mulf %20, %19 : vector<16x32xf32>
    %cst_15 = arith.constant 0.707106769 : f32
    %22 = vector.broadcast %cst_15 : f32 to vector<16x32xf32>
    %23 = arith.mulf %19, %22 : vector<16x32xf32>
    %24 = math.erf %23 : vector<16x32xf32>
    %cst_16 = arith.constant 1.000000e+00 : f32
    %25 = vector.broadcast %cst_16 : f32 to vector<16x32xf32>
    %26 = arith.addf %25, %24 : vector<16x32xf32>
    %27 = arith.mulf %21, %26 : vector<16x32xf32>
    %c0_17 = arith.constant 0 : index
    %c0_18 = arith.constant 0 : index
    %c0_19 = arith.constant 0 : index
    %28 = vector.load %arg6[%c0_17, %c0_18, %c0_19] : memref<2x16x32xf32, #tpu.memory_space<vmem>>, vector<1x16x32xf32>
    %29 = vector.shape_cast %28 : vector<1x16x32xf32> to vector<16x32xf32>
    %30 = vector.shape_cast %27 : vector<16x32xf32> to vector<1x16x32xf32>
    tpu.vector_store %arg6[%c0_17, %c0_18, %c0_19], %30 {strides = array<i32>} : memref<2x16x32xf32, #tpu.memory_space<vmem>>, vector<1x16x32xf32>,
    %c1 = arith.constant 1 : index
    %c0_20 = arith.constant 0 : index
    %c0_21 = arith.constant 0 : index
    %31 = vector.load %arg1[%c1, %c0_20, %c0_21] : memref<2x64x32xf32, #tpu.memory_space<vmem>>, vector<1x64x32xf32>
    %32 = vector.shape_cast %31 : vector<1x64x32xf32> to vector<64x32xf32>
    %c0_22 = arith.constant 0 : index
    %c0_23 = arith.constant 0 : index
    %33 = vector.load %arg2[%c0_22, %c0_23] : memref<32x64xf32, #tpu.memory_space<vmem>>, vector<32x64xf32>
    %c0_24 = arith.constant 0 : index
    %c0_25 = arith.constant 0 : index
    %34 = vector.load %arg3[%c0_24, %c0_25] : memref<32x1xf32, #tpu.memory_space<vmem>>, vector<32x1xf32>
    %c0_26 = arith.constant 0 : index
    %c0_27 = arith.constant 0 : index
    %35 = vector.load %arg4[%c0_26, %c0_27] : memref<16x32xf32, #tpu.memory_space<vmem>>, vector<16x32xf32>
    %c0_28 = arith.constant 0 : index
    %c0_29 = arith.constant 0 : index
    %36 = vector.load %arg5[%c0_28, %c0_29] : memref<16x1xf32, #tpu.memory_space<vmem>>, vector<16x1xf32>
    %cst_30 = arith.constant dense<0.000000e+00> : vector<32x32xf32>
    %37 = tpu.matmul %33, %32, %cst_30 {dimension_numbers = #tpu.dot_dimension_numbers<[1], [0], [0], [1], [0, 0, 1, 1], [], []>} : vector<32x64xf32>, vector<64x32xf32>, vector<32x32xf32> -> vector<32x32xf32>
    %38 = vector.broadcast %34 : vector<32x1xf32> to vector<32x32xf32>
    %39 = arith.addf %37, %38 : vector<32x32xf32>
    %cst_31 = arith.constant 5.000000e-01 : f32
    %40 = vector.broadcast %cst_31 : f32 to vector<32x32xf32>
    %41 = arith.mulf %40, %39 : vector<32x32xf32>
    %cst_32 = arith.constant 0.707106769 : f32
    %42 = vector.broadcast %cst_32 : f32 to vector<32x32xf32>
    %43 = arith.mulf %39, %42 : vector<32x32xf32>
    %44 = math.erf %43 : vector<32x32xf32>
    %cst_33 = arith.constant 1.000000e+00 : f32
    %45 = vector.broadcast %cst_33 : f32 to vector<32x32xf32>
    %46 = arith.addf %45, %44 : vector<32x32xf32>
    %47 = arith.mulf %41, %46 : vector<32x32xf32>
    %cst_34 = arith.constant dense<0.000000e+00> : vector<16x32xf32>
    %48 = tpu.matmul %35, %47, %cst_34 {dimension_numbers = #tpu.dot_dimension_numbers<[1], [0], [0], [1], [0, 0, 1, 1], [], []>} : vector<16x32xf32>, vector<32x32xf32>, vector<16x32xf32> -> vector<16x32xf32>
    %49 = vector.broadcast %36 : vector<16x1xf32> to vector<16x32xf32>
    %50 = arith.addf %48, %49 : vector<16x32xf32>
    %cst_35 = arith.constant 5.000000e-01 : f32
    %51 = vector.broadcast %cst_35 : f32 to vector<16x32xf32>
    %52 = arith.mulf %51, %50 : vector<16x32xf32>
    %cst_36 = arith.constant 0.707106769 : f32
    %53 = vector.broadcast %cst_36 : f32 to vector<16x32xf32>
    %54 = arith.mulf %50, %53 : vector<16x32xf32>
    %55 = math.erf %54 : vector<16x32xf32>
    %cst_37 = arith.constant 1.000000e+00 : f32
    %56 = vector.broadcast %cst_37 : f32 to vector<16x32xf32>
    %57 = arith.addf %56, %55 : vector<16x32xf32>
    %58 = arith.mulf %52, %57 : vector<16x32xf32>
    %c1_38 = arith.constant 1 : index
    %c0_39 = arith.constant 0 : index
    %c0_40 = arith.constant 0 : index
    %59 = vector.load %arg6[%c1_38, %c0_39, %c0_40] : memref<2x16x32xf32, #tpu.memory_space<vmem>>, vector<1x16x32xf32>
    %60 = vector.shape_cast %59 : vector<1x16x32xf32> to vector<16x32xf32>
    %61 = vector.shape_cast %58 : vector<16x32xf32> to vector<1x16x32xf32>
    tpu.vector_store %arg6[%c1_38, %c0_39, %c0_40], %61 {strides = array<i32>} : memref<2x16x32xf32, #tpu.memory_space<vmem>>, vector<1x16x32xf32>,
    return
  }
  func.func @transform_0(%arg0: i32) -> (i32, i32, i32) {
    %c0_i32 = arith.constant 0 : i32
    %c0_i32_0 = arith.constant 0 : i32
    %c0_i32_1 = arith.constant 0 : i32
    return %arg0, %c0_i32, %c0_i32_0 : i32, i32, i32
  }
  func.func @transform_1(%arg0: i32) -> (i32, i32) {
    %c0_i32 = arith.constant 0 : i32
    %c0_i32_0 = arith.constant 0 : i32
    %c0_i32_1 = arith.constant 0 : i32
    return %c0_i32, %c0_i32_0 : i32, i32
  }
  func.func @transform_2(%arg0: i32) -> (i32, i32) {
    %c0_i32 = arith.constant 0 : i32
    %c0_i32_0 = arith.constant 0 : i32
    %c0_i32_1 = arith.constant 0 : i32
    return %c0_i32, %c0_i32_0 : i32, i32
  }
  func.func @transform_3(%arg0: i32) -> (i32, i32) {
    %c0_i32 = arith.constant 0 : i32
    %c0_i32_0 = arith.constant 0 : i32
    %c0_i32_1 = arith.constant 0 : i32
    return %c0_i32, %c0_i32_0 : i32, i32
  }
  func.func @transform_4(%arg0: i32) -> (i32, i32) {
    %c0_i32 = arith.constant 0 : i32
    %c0_i32_0 = arith.constant 0 : i32
    %c0_i32_1 = arith.constant 0 : i32
    return %c0_i32, %c0_i32_0 : i32, i32
  }
  func.func @transform_5(%arg0: i32) -> (i32, i32, i32) {
    %c0_i32 = arith.constant 0 : i32
    %c0_i32_0 = arith.constant 0 : i32
    %c0_i32_1 = arith.constant 0 : i32
    return %arg0, %c0_i32, %c0_i32_0 : i32, i32, i32
  }
}

</mosaic_0001>

<bundles_post_ra>
// kernel: tpu_custom_call.1
= control target key start
LH: loop header
LB: loop body
LE: loop exit
PB: predicated region body
PF: predicated region fallthrough
CT: control target
= control target key end

     0   :  { %s1402_s0 = inlined_call_operand.vmem [shape: f32[2,64,32], index: 0, kind: input, shape index: {}]   ;;  %s1403_s1 = inlined_call_operand.vmem [shape: f32[32,64], index: 1, kind: input, shape index: {}]   ;;  %s1404_s2 = inlined_call_operand.vmem [shape: f32[32,1], index: 2, kind: input, shape index: {}]   ;;  %s1405_s3 = inlined_call_operand.vmem [shape: f32[16,32], index: 3, kind: input, shape index: {}]   ;;  %s1406_s4 = inlined_call_operand.vmem [shape: f32[16,1], index: 4, kind: input, shape index: {}]   ;;  %s1407_s5 = inlined_call_operand.hbm [shape: f32[2,16,32], index: 5, kind: output, shape index: {}]  }
   0x1   :  { %v28_v0 = vld [vmem:[%s1402_s0 + $0x38] sm:$0xff]  ;;  %v27_v2 = vld [vmem:[%s1402_s0 + $0x30] sm:$0xff]  ;;  %v26_v4 = vld [vmem:[%s1402_s0 + $0x28] sm:$0xff] }
   0x2   :  { %v834_v1 = vld [vmem:[%s1402_s0 + $0x78] sm:$0xff]  ;;  %82 = vmatpush.msra.mxu0 %v28_v0  ;;  %847 = vmatpush.msra.mxu1 %v28_v0  ;;  %v833_v3 = vld [vmem:[%s1402_s0 + $0x70] sm:$0xff]  ;;  %v832_v5 = vld [vmem:[%s1402_s0 + $0x68] sm:$0xff] }
   0x3   :  { %470 = vmatpush.msra.mxu2 %v834_v1  ;;  %855 = vmatpush.msra.mxu3 %v834_v1  ;;  %v25_v6 = vld [vmem:[%s1402_s0 + $0x20] sm:$0xff]  ;;  %v24_v8 = vld [vmem:[%s1402_s0 + $0x18] sm:$0xff]  ;;  %v23_v10 = vld [vmem:[%s1402_s0 + $0x10] sm:$0xff] }
   0x4   :  { %83 = vmatpush.msra.mxu0 %v27_v2  ;;  %848 = vmatpush.msra.mxu1 %v27_v2  ;;  %v831_v7 = vld [vmem:[%s1402_s0 + $0x60] sm:$0xff]  ;;  %v830_v9 = vld [vmem:[%s1402_s0 + $0x58] sm:$0xff] }
   0x5   :  { %471 = vmatpush.msra.mxu2 %v833_v3  ;;  %856 = vmatpush.msra.mxu3 %v833_v3 }
   0x6   :  { %84 = vmatpush.msra.mxu0 %v26_v4  ;;  %849 = vmatpush.msra.mxu1 %v26_v4 }
   0x7   :  { %472 = vmatpush.msra.mxu2 %v832_v5  ;;  %857 = vmatpush.msra.mxu3 %v832_v5 }
   0x8   :  { %85 = vmatpush.msra.mxu0 %v25_v6  ;;  %850 = vmatpush.msra.mxu1 %v25_v6 }
   0x9   :  { %473 = vmatpush.msra.mxu2 %v831_v7  ;;  %858 = vmatpush.msra.mxu3 %v831_v7 }
   0xa   :  { %10 = vsyncpa [#allocation3], 0  ;;  %86 = vmatpush.msra.mxu0 %v24_v8  ;;  %851 = vmatpush.msra.mxu1 %v24_v8  ;;  %v829_v11 = vld [vmem:[%s1402_s0 + $0x50] sm:$0xff]  ;;  %v423_v12 = vld [vmem:[%s1404_s2 + $0x8] sm:$0xff]  ;;  %v920_v13 = vmov 0   ;;  %vm61_vm0 = vcmask 523264  }
   0xb   :  { %474 = vmatpush.msra.mxu2 %v830_v9  ;;  %859 = vmatpush.msra.mxu3 %v830_v9  ;;  %v22_v14 = vld [vmem:[%s1402_s0 + $0x8] sm:$0xff]  ;;  %v21_v16 = vld [vmem:[%s1402_s0] sm:$0xff]  ;;  %v421_v19 = vld [vmem:[%s1403_s1 + $0x18] sm:$0xff]  ;;  %s803_s23 = sshll.u32 %s1407_s5, 4  ;;  %s922_s24 = smov 128   ;;  %s804_s23 = int_to_ptr.hbm [resolvable:$true] %s803_s23 }
   0xc   :  { %868 = vset.pattern.permute.xlu1 %v920_v13  ;;  %87 = vmatpush.msra.mxu0 %v23_v10  ;;  %v828_v15 = vld [vmem:[%s1402_s0 + $0x48] sm:$0xff]  ;;  %v827_v17 = vld [vmem:[%s1402_s0 + $0x40] sm:$0xff]  ;;  %v425_v20 = vld [vmem:[%s1404_s2 + $0x18] sm:$0xff]  ;;  %s923_s25 = smov 8  }
   0xd   :  { %475 = vmatpush.msra.mxu2 %v829_v11  ;;  %860 = vmatpush.msra.mxu3 %v829_v11  ;;  %v418_v18 = vld [vmem:[%s1403_s1] sm:$0xff]  ;;  %v30_v22 = vld [vmem:[%s1403_s1 + $0x8] sm:$0xff]  ;;  %v424_v23 = vld [vmem:[%s1404_s2 + $0x10] sm:$0xff] }
   0xe   :  { %437 = vperm.xlu1 %868, %v423_v12   ;;  %852 = vmatpush.msra.mxu1 %v23_v10  ;;  %v33_v21 = vld [vmem:[%s1404_s2] sm:$0xff]  ;;  %v31_v24 = vld [vmem:[%s1403_s1 + $0x10] sm:$0xff]  ;;  %v40_v26 = vld [vmem:[%s1406_s4 + $0x8] sm:$0xff] }
   0xf   :  { %88 = vmatpush.msra.mxu0 %v22_v14  ;;  %476 = vmatpush.msra.mxu2 %v828_v15  ;;  %v428_v25 = vld [vmem:[%s1406_s4] sm:$0xff] }
  0x10   :  { %853 = vmatpush.msra.mxu1 %v22_v14  ;;  %861 = vmatpush.msra.mxu3 %v828_v15 }
  0x11   :  { %89 = vmatpush.msra.mxu0 %v21_v16  ;;  %477 = vmatpush.msra.mxu2 %v827_v17 }
  0x12   :  { %854 = vmatpush.msra.mxu1 %v21_v16  ;;  %862 = vmatpush.msra.mxu3 %v827_v17 }
  0x13   :  { %835 = vmatmul.msk.f32.vlgmr.msra.gmra.mxu2 %vm61_vm0, %v418_v18  ;;  %838 = vmatmul.msk.f32.vlgmr.msra.gmra.mxu3 %vm61_vm0, %v421_v19 }
  0x14   :  { %867 = vset.pattern.permute.xlu0 %v920_v13  ;;  %815 = vmatmul.msk.f32.vlgmr.msra.gmra.mxu0 %vm61_vm0, %v418_v18 }
  0x15   :  { %818 = vmatmul.msk.f32.vlgmr.msra.gmra.mxu1 %vm61_vm0, %v421_v19  ;;  %447 = vperm.xlu0 %867, %v425_v20  }
  0x16   :  { %58 = vperm.xlu1 %868, %v425_v20   ;;  %869 = vset.pattern.permute.xlu2 %v920_v13 }
  0x17   :  { %432 = vperm.xlu2 %869, %v33_v21  }
  0x1b   :  { %836 = vmatmul.msk.f32.gmra.mxu2 %vm61_vm0, %v30_v22 }
  0x1c   :  { %816 = vmatmul.msk.f32.gmra.mxu0 %vm61_vm0, %v30_v22 }
  0x1d   :  { %442 = vperm.xlu0 %867, %v424_v23  }
  0x1e   :  { %43 = vperm.xlu1 %868, %v33_v21  }
  0x1f   :  { %53 = vperm.xlu2 %869, %v424_v23  }
  0x23   :  { %837 = vmatmul.msk.f32.gmra.mxu2 %vm61_vm0, %v31_v24 }
  0x24   :  { %817 = vmatmul.msk.f32.gmra.mxu0 %vm61_vm0, %v31_v24 }
  0x25   :  { %48 = vperm.xlu0 %867, %v423_v12  }
  0x26   :  { %669 = vperm.xlu1 %868, %v428_v25  }
  0x27   :  { %281 = vperm.xlu2 %869, %v428_v25  }
  0x2d   :  { %286 = vperm.xlu0 %867, %v40_v26  }
  0x2f   :  { %674 = vperm.xlu2 %869, %v40_v26  }
  0x71   :  { %v433_v43 = vpop.permute.xlu2 %432 }
  0x79   :  { %v54_v8 = vpop.permute.xlu2 %53 }
  0x80   :  { %v438_v27 = vpop.permute.xlu1 %437 }
  0x87   :  { %v448_v28 = vpop.permute.xlu0 %447 }
  0x88   :  { %v59_v29 = vpop.permute.xlu1 %58 }
  0x8f   :  { %v443_v30 = vpop.permute.xlu0 %442 }
  0x90   :  { %v44_v31 = vpop.permute.xlu1 %43 }
  0x91   :  { %v91_v32 = vpop.f32.mrf.mxu0 }
  0x92   :  { %v1040_v33 = vadd.f32 %v91_v32, %v44_v31  ;;  %v100_v34 = vpop.f32.mrf.mxu1 }
  0x93   :  { %v1042_v35 = vadd.f32 %v100_v34, %v59_v29 }
  0x94   :  { %v1045_v36 = vmul.f32 0.70710677, %v1040_v33 }
  0x95   :  { %v1048_v37 = vmul.f32 0.70710677, %v1042_v35 }
  0x96   :  { %v111_v38 = vmul.f32 %v1045_v36, %v1045_v36  ;;  %v479_v39 = vpop.f32.mrf.mxu2  ;;  %v488_v40 = vpop.f32.mrf.mxu3 }
  0x97   :  { %v231_v41 = vmul.f32 %v1048_v37, %v1048_v37  ;;  %v1054_v42 = vadd.f32 %v488_v40, %v448_v28  ;;  %v49_v46 = vpop.permute.xlu0 %48  ;;  %v1073_v57 = vadd.f32 %v479_v39, %v433_v43 }
  0x98   :  { %v1056_v44 = vmin.f32 %v111_v38, 16.0 }
  0x99   :  { %v1058_v45 = vmin.f32 %v231_v41, 16.0  ;;  %v94_v47 = vpop.f32.mrf.mxu0  ;;  %v1062_v49 = vmul.f32 0.70710677, %v1054_v42  ;;  %v1087_v5 = vmul.f32 0.70710677, %v1073_v57 }
  0x9a   :  { %v113_v48 = vmul.f32 2.1237322e-06, %v1056_v44  ;;  %v1064_v50 = vadd.f32 %v94_v47, %v49_v46 }
  0x9b   :  { %v233_v51 = vmul.f32 2.1237322e-06, %v1058_v45  ;;  %v244_v52 = vmul.f32 3.8918573e-05, %v1058_v45  ;;  %v619_v54 = vmul.f32 %v1062_v49, %v1062_v49  ;;  %v499_v19 = vmul.f32 %v1087_v5, %v1087_v5 }
  0x9c   :  { %v114_v53 = vadd.f32 0.00028619796, %v113_v48  ;;  %v1071_v55 = vmul.f32 0.70710677, %v1064_v50 }
  0x9d   :  { %v234_v56 = vadd.f32 0.00028619796, %v233_v51  ;;  %v1076_v59 = vmin.f32 %v619_v54, 16.0  ;;  %v245_v0 = vadd.f32 0.001143296, %v244_v52  ;;  %v1117_v39 = vmin.f32 %v499_v19, 16.0 }
  0x9e   :  { %v115_v58 = vmul.f32 %v114_v53, %v1056_v44  ;;  %v151_v60 = vmul.f32 %v1071_v55, %v1071_v55  ;;  %v482_v61 = vpop.f32.mrf.mxu2  ;;  %v124_v51 = vmul.f32 3.8918573e-05, %v1056_v44 }
  0x9f   :  { %v235_v62 = vmul.f32 %v234_v56, %v1058_v45  ;;  %v1081_v63 = vadd.f32 %v482_v61, %v438_v27  ;;  %v621_v2 = vmul.f32 2.1237322e-06, %v1076_v59  ;;  %v246_v17 = vmul.f32 %v245_v0, %v1058_v45 }
  0xa0   :  { %v116_v1 = vadd.f32 0.0036580483, %v115_v58  ;;  %v1084_v3 = vmin.f32 %v151_v60, 16.0  ;;  %v501_v58 = vmul.f32 2.1237322e-06, %v1117_v39 }
  0xa1   :  { %v236_v4 = vadd.f32 0.0036580483, %v235_v62  ;;  %v97_v6 = vpop.f32.mrf.mxu0  ;;  %v622_v9 = vadd.f32 0.00028619796, %v621_v2  ;;  %v1092_v11 = vmul.f32 0.70710677, %v1081_v63 }
  0xa2   :  { %v117_v7 = vmul.f32 %v116_v1, %v1056_v44  ;;  %v153_v10 = vmul.f32 2.1237322e-06, %v1084_v3  ;;  %v1095_v13 = vadd.f32 %v97_v6, %v54_v8  ;;  %v247_v31 = vadd.f32 0.014752088, %v246_v17 }
  0xa3   :  { %v237_v12 = vmul.f32 %v236_v4, %v1058_v45  ;;  %v623_v14 = vmul.f32 %v622_v9, %v1076_v59  ;;  %v539_v16 = vmul.f32 %v1092_v11, %v1092_v11  ;;  %v125_v4 = vadd.f32 0.001143296, %v124_v51 }
  0xa4   :  { %v154_v15 = vadd.f32 0.00028619796, %v153_v10  ;;  %v118_v18 = vadd.f32 0.05243302, %v117_v7  ;;  %v1107_v25 = vmul.f32 0.70710677, %v1095_v13  ;;  %v248_v48 = vmul.f32 %v247_v31, %v1058_v45 }
  0xa5   :  { %v238_v20 = vadd.f32 0.05243302, %v237_v12  ;;  %v624_v21 = vadd.f32 0.0036580483, %v623_v14  ;;  %v1104_v23 = vmin.f32 %v539_v16, 16.0 }
  0xa6   :  { %v155_v22 = vmul.f32 %v154_v15, %v1084_v3  ;;  %v485_v24 = vpop.f32.mrf.mxu2  ;;  %v191_v32 = vmul.f32 %v1107_v25, %v1107_v25  ;;  %v119_v34 = vmul.f32 %v118_v18, %v1056_v44  ;;  %v249_v2 = vadd.f32 0.112945676, %v248_v48 }
  0xa7   :  { %v1109_v26 = vadd.f32 %v485_v24, %v443_v30  ;;  %v625_v27 = vmul.f32 %v624_v21, %v1076_v59  ;;  %v541_v29 = vmul.f32 2.1237322e-06, %v1104_v23  ;;  %v239_v38 = vmul.f32 %v238_v20, %v1058_v45 }
  0xa8   :  { %v156_v28 = vadd.f32 0.0036580483, %v155_v22  ;;  %v1120_v30 = vmin.f32 %v191_v32, 16.0  ;;  %v120_v54 = vadd.f32 0.18741608, %v119_v34  ;;  %v250_v14 = vmul.f32 %v249_v2, %v1058_v45 }
  0xa9   :  { %v626_v40 = vadd.f32 0.05243302, %v625_v27  ;;  %v1123_v43 = vmul.f32 0.70710677, %v1109_v26  ;;  %v542_v47 = vadd.f32 0.00028619796, %v541_v29  ;;  %v126_v22 = vmul.f32 %v125_v4, %v1056_v44 }
  0xaa   :  { %v157_v41 = vmul.f32 %v156_v28, %v1084_v3  ;;  %v193_v52 = vmul.f32 2.1237322e-06, %v1120_v30  ;;  %v240_v56 = vadd.f32 0.18741608, %v239_v38  ;;  %v632_v8 = vmul.f32 3.8918573e-05, %v1076_v59 }
  0xab   :  { %v627_v46 = vmul.f32 %v626_v40, %v1076_v59  ;;  %v579_v53 = vmul.f32 %v1123_v43, %v1123_v43  ;;  %v543_v1 = vmul.f32 %v542_v47, %v1104_v23  ;;  %v121_v9 = vmul.f32 %v120_v54, %v1056_v44 }
  0xac   :  { %v158_v60 = vadd.f32 0.05243302, %v157_v41  ;;  %v194_v61 = vadd.f32 0.00028619796, %v193_v52  ;;  %v241_v10 = vmul.f32 %v240_v56, %v1058_v45  ;;  %v502_v12 = vadd.f32 0.00028619796, %v501_v58 }
  0xad   :  { %v1132_v62 = vmin.f32 %v579_v53, 16.0  ;;  %v628_v0 = vadd.f32 0.18741608, %v627_v46  ;;  %v633_v18 = vadd.f32 0.001143296, %v632_v8 }
  0xae   :  { %v195_v6 = vmul.f32 %v194_v61, %v1120_v30  ;;  %v159_v15 = vmul.f32 %v158_v60, %v1084_v3  ;;  %v544_v20 = vadd.f32 0.0036580483, %v543_v1  ;;  %v251_v21 = vadd.f32 0.4994258, %v250_v14 }
  0xaf   :  { %v581_v7 = vmul.f32 2.1237322e-06, %v1132_v62  ;;  %v629_v19 = vmul.f32 %v628_v0, %v1076_v59  ;;  %v634_v28 = vmul.f32 %v633_v18, %v1076_v59  ;;  %v204_v29 = vmul.f32 3.8918573e-05, %v1120_v30 }
  0xb0   :  { %v196_v16 = vadd.f32 0.0036580483, %v195_v6  ;;  %v122_v31 = vadd.f32 1.1283791, %v121_v9  ;;  %v242_v32 = vadd.f32 1.1283791, %v241_v10  ;;  %v252_v34 = vmul.f32 %v251_v21, %v1058_v45 }
  0xb1   :  { %v582_v17 = vadd.f32 0.00028619796, %v581_v7  ;;  %v164_v38 = vmul.f32 3.8918573e-05, %v1084_v3  ;;  %v503_v40 = vmul.f32 %v502_v12, %v1117_v39  ;;  %v160_v41 = vadd.f32 0.18741608, %v159_v15 }
  0xb2   :  { %v197_v24 = vmul.f32 %v196_v16, %v1120_v30  ;;  %v635_v47 = vadd.f32 0.014752088, %v634_v28  ;;  %v1151_v48 = vadd.f32 1.0, %v252_v34  ;;  %v205_v51 = vadd.f32 0.001143296, %v204_v29 }
  0xb3   :  { %v583_v27 = vmul.f32 %v582_v17, %v1132_v62  ;;  %v165_v52 = vadd.f32 0.001143296, %v164_v38  ;;  %v630_v53 = vadd.f32 1.1283791, %v629_v19  ;;  %v545_v54 = vmul.f32 %v544_v20, %v1104_v23 }
  0xb4   :  { %v198_v46 = vadd.f32 0.05243302, %v197_v24  ;;  %v636_v58 = vmul.f32 %v635_v47, %v1076_v59  ;;  %v1156_v60 = vmul.f32 0.5, %v1042_v35  ;;  %v1159_v45 = vmul.f32 0.5, %v1054_v42 }
  0xb5   :  { %v584_v56 = vadd.f32 0.0036580483, %v583_v27  ;;  %870 = vrcp.f32 %v1151_v48  ;;  %v127_v61 = vadd.f32 0.014752088, %v126_v22  ;;  %v1162_v0 = vadd.f32 0.0036580483, %v503_v40 }
  0xb6   :  { %v161_v1 = vmul.f32 %v160_v41, %v1084_v3  ;;  %v199_v2 = vmul.f32 %v198_v46, %v1120_v30  ;;  %v206_v4 = vmul.f32 %v205_v51, %v1120_v30  ;;  %v1168_v6 = vmul.f32 %v122_v31, %v1045_v36 }
  0xb7   :  { %v243_v35 = vmul.f32 %v242_v32, %v1048_v37  ;;  %v637_v7 = vadd.f32 0.112945676, %v636_v58  ;;  %v166_v42 = vmul.f32 %v165_v52, %v1084_v3  ;;  %v1173_v8 = vmul.f32 %v630_v53, %v1062_v49 }
  0xb8   :  { %v546_v9 = vadd.f32 0.05243302, %v545_v54  ;;  %v585_v10 = vmul.f32 %v584_v56, %v1132_v62  ;;  %v207_v12 = vadd.f32 0.014752088, %v206_v4  ;;  %v128_v16 = vmul.f32 %v127_v61, %v1056_v44 }
  0xb9   :  { %v638_v14 = vmul.f32 %v637_v7, %v1076_v59  ;;  %v167_v15 = vadd.f32 0.014752088, %v166_v42  ;;  %v592_v36 = vmul.f32 3.8918573e-05, %v1132_v62  ;;  %v162_v17 = vadd.f32 1.1283791, %v161_v1 }
  0xba   :  { %v200_v18 = vadd.f32 0.18741608, %v199_v2  ;;  %v208_v37 = vmul.f32 %v207_v12, %v1120_v30  ;;  %v552_v19 = vmul.f32 3.8918573e-05, %v1104_v23  ;;  %v129_v22 = vadd.f32 0.112945676, %v128_v16 }
  0xbb   :  { %v871_v20 = vpop.eup %870  ;;  %v639_v49 = vadd.f32 0.4994258, %v638_v14  ;;  %v168_v21 = vmul.f32 %v167_v15, %v1084_v3  ;;  %v593_v24 = vadd.f32 0.001143296, %v592_v36  ;;  %v586_v27 = vadd.f32 0.05243302, %v585_v10 }
  0xbc   :  { %v255_v28 = vmul.f32 %v871_v20, %v1151_v48  ;;  %v263_v29 = vand.u32 2147483647, %v1151_v48  ;;  %v265_v31 = vand.u32 2147483648, %v1151_v48  ;;  %v209_v34 = vadd.f32 0.112945676, %v208_v37 }
  0xbd   :  { %v640_v32 = vmul.f32 %v639_v49, %v1076_v59  ;;  %v169_v38 = vadd.f32 0.112945676, %v168_v21  ;;  %v130_v40 = vmul.f32 %v129_v22, %v1056_v44  ;;  %v201_v41 = vmul.f32 %v200_v18, %v1120_v30 }
  0xbe   :  { %v256_v46 = vsub.f32 1.0, %v255_v28  ;;  %v594_v47 = vmul.f32 %v593_v24, %v1132_v62  ;;  %v553_v51 = vadd.f32 0.001143296, %v552_v19  ;;  %v210_v53 = vmul.f32 %v209_v34, %v1120_v30 }
  0xbf   :  { %v1189_v52 = vadd.f32 1.0, %v640_v32  ;;  %v170_v54 = vmul.f32 %v169_v38, %v1084_v3  ;;  %v131_v56 = vadd.f32 0.4994258, %v130_v40  ;;  %v547_v58 = vmul.f32 %v546_v9, %v1104_v23 }
  0xc0   :  { %v257_v59 = vmul.f32 %v871_v20, %v256_v46  ;;  %vm260_vm1 = vweird.f32 %v871_v20  ;;  %v595_v61 = vadd.f32 0.014752088, %v594_v47  ;;  %vm259_vm2 = vweird.f32 %v1151_v48 }
  0xc1   :  { %vm1195_vm3 = vcmp.eq.f32.partialorder %v263_v29, 8.507059e+37  ;;  %872 = vrcp.f32 %v1189_v52  ;;  %v554_v2 = vmul.f32 %v553_v51, %v1104_v23  ;;  %v211_v7 = vadd.f32 0.4994258, %v210_v53  ;;  %vm261_vm4 = vmor %vm259_vm2, %vm260_vm1 }
  0xc2   :  { %v258_v4 = vadd.f32 %v871_v20, %v257_v59  ;;  %v171_v42 = vadd.f32 0.4994258, %v170_v54  ;;  %v132_v10 = vmul.f32 %v131_v56, %v1056_v44  ;;  %v202_v12 = vadd.f32 1.1283791, %v201_v41 }
  0xc3   :  { %v587_v9 = vmul.f32 %v586_v27, %v1132_v62  ;;  %v266_v14 = vor.u32 1.1754944e-38, %v265_v31  ;;  %v596_v48 = vmul.f32 %v595_v61, %v1132_v62  ;;  %v212_v16 = vmul.f32 %v211_v7, %v1120_v30 }
  0xc4   :  { %v262_v15 = vsel %vm261_vm4, %v871_v20, %v258_v4  ;;  %v172_v36 = vmul.f32 %v171_v42, %v1084_v3  ;;  %v1206_v18 = vadd.f32 1.0, %v132_v10  ;;  %v651_v19 = vand.u32 2147483647, %v1189_v52 }
  0xc5   :  { %v267_v37 = vsel %vm1195_vm3, %v266_v14, %v262_v15  ;;  %v597_v44 = vadd.f32 0.112945676, %v596_v48  ;;  %v555_v49 = vadd.f32 0.014752088, %v554_v2  ;;  %v1211_v22 = vadd.f32 1.0, %v212_v16 }
  0xc6   :  { %v268_v21 = vmul.f32 %v267_v37, %v243_v35  ;;  %v1213_v24 = vadd.f32 1.0, %v172_v36  ;;  %874 = vrcp.f32 %v1206_v18  ;;  %v1217_v30 = vmul.f32 %v162_v17, %v1071_v55 }
  0xc7   :  { %v873_v20 = vpop.eup %872  ;;  %v1219_v3 = vadd.f32 0.18741608, %v547_v58  ;;  %v1221_v27 = vadd.f32 0.18741608, %v587_v9  ;;  %v653_v28 = vand.u32 2147483648, %v1189_v52  ;;  %v1225_v29 = vmul.f32 %v202_v12, %v1107_v25 }
  0xc8   :  { %v822_v35 = vclamps-f32 %v268_v21, 1.0  ;;  %v643_v31 = vmul.f32 %v873_v20, %v1189_v52  ;;  %876 = vrcp.f32 %v1211_v22  ;;  %vm647_vm5 = vweird.f32 %v1189_v52 }
  0xc9   :  { %v225_v32 = vand.u32 2147483648, %v1211_v22  ;;  %878 = vrcp.f32 %v1213_v24  ;;  %v598_v55 = vmul.f32 %v597_v44, %v1132_v62  ;;  %vm1233_vm6 = vcmp.eq.f32.partialorder %v651_v19, 8.507059e+37 }
  0xca   :  { %v274_v17 = vadd.f32 1.0, %v822_v35  ;;  %v644_v34 = vsub.f32 1.0, %v643_v31  ;;  %v556_v25 = vmul.f32 %v555_v49, %v1104_v23  ;;  %v654_v40 = vor.u32 1.1754944e-38, %v653_v28 }
  0xcb   :  { %v223_v41 = vand.u32 2147483647, %v1211_v22  ;;  %vm139_vm7 = vweird.f32 %v1206_v18  ;;  %v143_v46 = vand.u32 2147483647, %v1206_v18  ;;  %vm648_vm8 = vweird.f32 %v873_v20 }
  0xcc   :  { %v875_v47 = vpop.eup %874  ;;  %v278_v51 = vmul.f32 %v274_v17, %v1156_v60  ;;  %v645_v53 = vmul.f32 %v873_v20, %v644_v34  ;;  %v145_v54 = vand.u32 2147483648, %v1206_v18  ;;  %vm219_vm9 = vweird.f32 %v1211_v22  ;;  %vm649_vm11 = vmor %vm647_vm5, %vm648_vm8 }
  0xcd   :  { %v226_v56 = vor.u32 1.1754944e-38, %v225_v32  ;;  %v183_v58 = vand.u32 2147483647, %v1213_v24  ;;  %v135_v59 = vmul.f32 %v875_v47, %v1206_v18  ;;  %v599_v61 = vadd.f32 0.4994258, %v598_v55 }
  0xce   :  { %v877_v1 = vpop.eup %876  ;;  %308 = vmatpush.msrb.mxu1 %v278_v51  ;;  %v646_v2 = vadd.f32 %v873_v20, %v645_v53  ;;  %vm179_vm10 = vweird.f32 %v1213_v24  ;;  %v185_v4 = vand.u32 2147483648, %v1213_v24  ;;  %v557_v60 = vadd.f32 0.112945676, %v556_v25 }
  0xcf   :  { %v512_v7 = vmul.f32 3.8918573e-05, %v1117_v39  ;;  %v879_v42 = vpop.eup %878  ;;  %v215_v10 = vmul.f32 %v877_v1, %v1211_v22  ;;  %vm1253_vm12 = vcmp.eq.f32.partialorder %v223_v41, 8.507059e+37  ;;  %v136_v9 = vsub.f32 1.0, %v135_v59 }
  0xd0   :  { %vm1257_vm13 = vcmp.eq.f32.partialorder %v143_v46, 8.507059e+37  ;;  %v600_v48 = vmul.f32 %v599_v61, %v1132_v62  ;;  %v650_v15 = vsel %vm649_vm11, %v873_v20, %v646_v2  ;;  %v175_v16 = vmul.f32 %v879_v42, %v1213_v24 }
  0xd1   :  { %vm140_vm14 = vweird.f32 %v875_v47  ;;  %v558_v52 = vmul.f32 %v557_v60, %v1104_v23  ;;  %v655_v36 = vsel %vm1233_vm6, %v654_v40, %v650_v15  ;;  %v216_v37 = vsub.f32 1.0, %v215_v10 }
  0xd2   :  { %v137_v19 = vmul.f32 %v875_v47, %v136_v9  ;;  %v1266_v44 = vadd.f32 1.0, %v600_v48  ;;  %v656_v49 = vmul.f32 %v655_v36, %v1173_v8  ;;  %v176_v21 = vsub.f32 1.0, %v175_v16  ;;  %vm141_vm1 = vmor %vm139_vm7, %vm140_vm14 }
  0xd3   :  { %v559_v28 = vadd.f32 0.4994258, %v558_v52  ;;  %v513_v35 = vadd.f32 0.001143296, %v512_v7  ;;  %v217_v31 = vmul.f32 %v877_v1, %v216_v37  ;;  %vm220_vm15 = vweird.f32 %v877_v1 }
  0xd4   :  { %v138_v20 = vadd.f32 %v875_v47, %v137_v19  ;;  %880 = vrcp.f32 %v1266_v44  ;;  %v842_v32 = vclamps-f32 %v656_v49, 1.0  ;;  %v177_v55 = vmul.f32 %v879_v42, %v176_v21  ;;  %vm221_vm2 = vmor %vm219_vm9, %vm220_vm15 }
  0xd5   :  { %vm180_vm0 = vweird.f32 %v879_v42  ;;  %v146_v17 = vor.u32 1.1754944e-38, %v145_v54  ;;  %v218_v34 = vadd.f32 %v877_v1, %v217_v31  ;;  %v560_v8 = vmul.f32 %v559_v28, %v1104_v23 }
  0xd6   :  { %v142_v38 = vsel %vm141_vm1, %v875_v47, %v138_v20  ;;  %v514_v25 = vmul.f32 %v513_v35, %v1117_v39  ;;  %v662_v40 = vadd.f32 1.0, %v842_v32  ;;  %v178_v41 = vadd.f32 %v879_v42, %v177_v55  ;;  %vm181_vm4 = vmor %vm179_vm10, %vm180_vm0 }
  0xd7   :  { %vm184_vm3 = vcmp.eq.f32.partialorder %v183_v58, 8.507059e+37  ;;  %v147_v46 = vsel %vm1257_vm13, %v146_v17, %v142_v38  ;;  %v222_v51 = vsel %vm221_vm2, %v877_v1, %v218_v34  ;;  %v186_v18 = vor.u32 1.1754944e-38, %v185_v4 }
  0xd8   :  { %v148_v47 = vmul.f32 %v147_v46, %v1168_v6  ;;  %v1282_v53 = vadd.f32 1.0, %v560_v8  ;;  %v666_v54 = vmul.f32 %v662_v40, %v1159_v45  ;;  %v227_v22 = vsel %vm1253_vm12, %v226_v56, %v222_v51 }
  0xd9   :  { %v182_v59 = vsel %vm181_vm4, %v879_v42, %v178_v41  ;;  %v515_v61 = vadd.f32 0.014752088, %v514_v25  ;;  %v589_v2 = vmul.f32 %v1221_v27, %v1132_v62  ;;  %v228_v1 = vmul.f32 %v227_v22, %v1225_v29 }
  0xda   :  { %v881_v58 = vpop.eup %880  ;;  %v187_v24 = vsel %vm184_vm3, %v186_v18, %v182_v59  ;;  %882 = vrcp.f32 %v1282_v53  ;;  %v103_v6 = vmul.f32 0.5, %v1040_v33  ;;  %695 = vmatpush.msrb.mxu3 %v666_v54  ;;  %v505_v56 = vmul.f32 %v1162_v0, %v1117_v39 }
  0xdb   :  { %v188_v4 = vmul.f32 %v187_v24, %v1217_v30  ;;  %v603_v45 = vmul.f32 %v881_v58, %v1266_v44  ;;  %v105_v60 = vmul.f32 0.5, %v1095_v13  ;;  %v821_v7 = vclamps-f32 %v228_v1, 1.0 }
  0xdc   :  { %v819_v42 = vclamps-f32 %v148_v47, 1.0  ;;  %v549_v62 = vmul.f32 %v1219_v3, %v1104_v23  ;;  %v516_v10 = vmul.f32 %v515_v61, %v1117_v39  ;;  %v590_v33 = vadd.f32 1.1283791, %v589_v2 }
  0xdd   :  { %v820_v27 = vclamps-f32 %v188_v4, 1.0  ;;  %v604_v29 = vsub.f32 1.0, %v603_v45  ;;  %v273_v12 = vadd.f32 1.0, %v821_v7  ;;  %v611_v30 = vand.u32 2147483647, %v1266_v44 }
  0xde   :  { %v613_v9 = vand.u32 2147483648, %v1266_v44  ;;  %vm608_vm5 = vweird.f32 %v881_v58  ;;  %v517_v0 = vadd.f32 0.112945676, %v516_v10  ;;  %v506_v15 = vadd.f32 0.05243302, %v505_v56 }
  0xdf   :  { %v272_v14 = vadd.f32 1.0, %v820_v27  ;;  %v605_v48 = vmul.f32 %v881_v58, %v604_v29  ;;  %v104_v16 = vmul.f32 0.5, %v1064_v50  ;;  %v277_v52 = vmul.f32 %v273_v12, %v105_v60 }
  0xe0   :  { %v883_v13 = vpop.eup %882  ;;  %v271_v23 = vadd.f32 1.0, %v819_v42  ;;  %v550_v3 = vadd.f32 1.1283791, %v549_v62  ;;  %vm607_vm6 = vweird.f32 %v1266_v44  ;;  %v591_v19 = vmul.f32 %v590_v33, %v1123_v43  ;;  %v37_v44 = vld [vmem:[%s1405_s3] sm:$0xff] }
  0xe1   :  { %v606_v36 = vadd.f32 %v881_v58, %v605_v48  ;;  %v563_v37 = vmul.f32 %v883_v13, %v1282_v53  ;;  %309 = vmatpush.msrb.mxu1 %v277_v52  ;;  %v276_v49 = vmul.f32 %v272_v14, %v104_v16  ;;  %vm609_vm7 = vmor %vm607_vm6, %vm608_vm5  ;;  %v614_v21 = vor.u32 1.1754944e-38, %v613_v9  ;;  %v282_v14 = vpop.permute.xlu2 %281 }
  0xe2   :  { %v518_v28 = vmul.f32 %v517_v0, %v1117_v39  ;;  %vm289_vm8 = vcmask 261120   ;;  %vm612_vm9 = vcmp.eq.f32.partialorder %v611_v30, 8.507059e+37  ;;  %v275_v31 = vmul.f32 %v271_v23, %v103_v6 }
  0xe3   :  { %v610_v35 = vsel %vm609_vm7, %v881_v58, %v606_v36  ;;  %v564_v50 = vsub.f32 1.0, %v563_v37  ;;  %310 = vmatpush.msrb.mxu1 %v276_v49  ;;  %v573_v32 = vand.u32 2147483648, %v1282_v53  ;;  %vm568_vm10 = vweird.f32 %v883_v13 }
  0xe4   :  { %v615_v20 = vsel %vm612_vm9, %v614_v21, %v610_v35  ;;  %v519_v43 = vadd.f32 0.4994258, %v518_v28  ;;  %v571_v34 = vand.u32 2147483647, %v1282_v53  ;;  %vm567_vm11 = vweird.f32 %v1282_v53  ;;  %v38_v53 = vld [vmem:[%s1405_s3 + $0x8] sm:$0xff]  ;;  %v287_v35 = vpop.permute.xlu0 %286  ;;  %s921_s3 = smov [#allocation2]  }
  0xe5   :  { %v616_v55 = vmul.f32 %v615_v20, %v591_v19  ;;  %v565_v17 = vmul.f32 %v883_v13, %v564_v50  ;;  %311 = vmatpush.msrb.mxu1 %v275_v31  ;;  %v507_v40 = vmul.f32 %v506_v15, %v1117_v39  ;;  %v493_v41 = vmul.f32 0.5, %v1109_v26  ;;  %vm569_vm12 = vmor %vm567_vm11, %vm568_vm10  ;;  %s801_s20 = sshll.u32 %s921_s3, 4  ;;  %s802_s20 = int_to_ptr.vmem [resolvable:$true] %s801_s20 }
  0xe6   :  { %v520_v38 = vmul.f32 %v519_v43, %v1117_v39  ;;  %823 = vmatmul.msk.f32.vlgmr.msrb.gmra.mxu1 %vm289_vm8, %v37_v44  ;;  %v574_v46 = vor.u32 1.1754944e-38, %v573_v32  ;;  %v551_v18 = vmul.f32 %v550_v3, %v1092_v11  ;;  %vm572_vm13 = vcmp.eq.f32.partialorder %v571_v34, 8.507059e+37 }
  0xe7   :  { %v841_v8 = vclamps-f32 %v616_v55, 1.0  ;;  %v566_v25 = vadd.f32 %v883_v13, %v565_v17  ;;  %v508_v58 = vadd.f32 0.18741608, %v507_v40  ;;  %v492_v26 = vmul.f32 0.5, %v1081_v63 }
  0xe8   :  { %v521_v51 = vadd.f32 1.0, %v520_v38  ;;  %v491_v12 = vmul.f32 0.5, %v1073_v57 }
  0xe9   :  { %v661_v47 = vadd.f32 1.0, %v841_v8  ;;  %v570_v54 = vsel %vm569_vm12, %v883_v13, %v566_v25  ;;  %v509_v24 = vmul.f32 %v508_v58, %v1117_v39 }
  0xea   :  { %v575_v22 = vsel %vm572_vm13, %v574_v46, %v570_v54  ;;  %884 = vrcp.f32 %v521_v51  ;;  %v533_v56 = vand.u32 2147483648, %v521_v51  ;;  %v531_v42 = vand.u32 2147483647, %v521_v51 }
  0xeb   :  { %v665_v59 = vmul.f32 %v661_v47, %v493_v41  ;;  %v576_v61 = vmul.f32 %v575_v22, %v551_v18  ;;  %v510_v60 = vadd.f32 1.1283791, %v509_v24  ;;  %vm527_vm15 = vweird.f32 %v521_v51 }
  0xec   :  { %v534_v27 = vor.u32 1.1754944e-38, %v533_v56  ;;  %vm532_vm1 = vcmp.eq.f32.partialorder %v531_v42, 8.507059e+37 }
  0xed   :  { %696 = vmatpush.msrb.mxu3 %v665_v59  ;;  %v840_v2 = vclamps-f32 %v576_v61, 1.0  ;;  %v511_v63 = vmul.f32 %v510_v60, %v1087_v5  ;;  %v670_v61 = vpop.permute.xlu1 %669 }
  0xee   :  { %824 = vmatmul.msk.f32.gmra.mxu1 %vm289_vm8, %v38_v53 }
  0xef   :  { %v660_v1 = vadd.f32 1.0, %v840_v2 }
  0xf0   :  { %v885_v11 = vpop.eup %884 }
  0xf1   :  { %v664_v6 = vmul.f32 %v660_v1, %v492_v26  ;;  %v523_v4 = vmul.f32 %v885_v11, %v521_v51  ;;  %vm528_vm14 = vweird.f32 %v885_v11 }
  0xf2   :  { %vm529_vm0 = vmor %vm527_vm15, %vm528_vm14 }
  0xf3   :  { %697 = vmatpush.msrb.mxu3 %v664_v6  ;;  %v524_v45 = vsub.f32 1.0, %v523_v4 }
  0xf5   :  { %v525_v7 = vmul.f32 %v885_v11, %v524_v45 }
  0xf7   :  { %v526_v62 = vadd.f32 %v885_v11, %v525_v7 }
  0xf9   :  { %v530_v29 = vsel %vm529_vm0, %v885_v11, %v526_v62 }
  0xfa   :  { %v535_v10 = vsel %vm532_vm1, %v534_v27, %v530_v29 }
  0xfb   :  { %v536_v33 = vmul.f32 %v535_v10, %v511_v63  ;;  %v675_v63 = vpop.permute.xlu2 %674 }
  0xfd   :  { %v839_v39 = vclamps-f32 %v536_v33, 1.0 }
  0xff   :  { %v659_v30 = vadd.f32 1.0, %v839_v39 }
 0x101   :  { %v663_v9 = vmul.f32 %v659_v30, %v491_v12 }
 0x103   :  { %698 = vmatpush.msrb.mxu3 %v663_v9 }
 0x104   :  { %843 = vmatmul.msk.f32.vlgmr.msrb.gmra.mxu3 %vm289_vm8, %v37_v44 }
 0x10c   :  { %844 = vmatmul.msk.f32.gmra.mxu3 %vm289_vm8, %v38_v53 }
 0x163   :  { %v313_v48 = vpop.f32.mrf.mxu1 }
 0x164   :  { %v1328_v0 = vadd.f32 %v313_v48, %v282_v14 }
 0x166   :  { %v321_v5 = vmul.f32 0.70710677, %v1328_v0 }
 0x168   :  { %v323_v13 = vmul.f32 %v321_v5, %v321_v5 }
 0x16a   :  { %v324_v15 = vmin.f32 %v323_v13, 16.0 }
 0x16b   :  { %v316_v50 = vpop.f32.mrf.mxu1 }
 0x16c   :  { %v325_v16 = vmul.f32 2.1237322e-06, %v324_v15  ;;  %v336_v52 = vmul.f32 3.8918573e-05, %v324_v15  ;;  %v1331_v44 = vadd.f32 %v316_v50, %v287_v35 }
 0x16e   :  { %v326_v23 = vadd.f32 0.00028619796, %v325_v16  ;;  %v337_v3 = vadd.f32 0.001143296, %v336_v52  ;;  %v1334_v43 = vmul.f32 0.70710677, %v1331_v44 }
 0x170   :  { %v327_v57 = vmul.f32 %v326_v23, %v324_v15  ;;  %v338_v36 = vmul.f32 %v337_v3, %v324_v15  ;;  %v363_v17 = vmul.f32 %v1334_v43, %v1334_v43 }
 0x172   :  { %v328_v37 = vadd.f32 0.0036580483, %v327_v57  ;;  %v339_v19 = vadd.f32 0.014752088, %v338_v36  ;;  %v1338_v8 = vmin.f32 %v363_v17, 16.0 }
 0x174   :  { %v340_v49 = vmul.f32 %v339_v19, %v324_v15  ;;  %v329_v21 = vmul.f32 %v328_v37, %v324_v15  ;;  %v365_v25 = vmul.f32 2.1237322e-06, %v1338_v8  ;;  %v376_v40 = vmul.f32 3.8918573e-05, %v1338_v8 }
 0x176   :  { %v341_v28 = vadd.f32 0.112945676, %v340_v49  ;;  %v330_v20 = vadd.f32 0.05243302, %v329_v21  ;;  %v366_v46 = vadd.f32 0.00028619796, %v365_v25 }
 0x177   :  { %v377_v51 = vadd.f32 0.001143296, %v376_v40 }
 0x178   :  { %v342_v31 = vmul.f32 %v341_v28, %v324_v15  ;;  %v331_v34 = vmul.f32 %v330_v20, %v324_v15  ;;  %v367_v18 = vmul.f32 %v366_v46, %v1338_v8  ;;  %v319_v28 = vmul.f32 0.5, %v1328_v0 }
 0x179   :  { %v378_v47 = vmul.f32 %v377_v51, %v1338_v8 }
 0x17a   :  { %v343_v32 = vadd.f32 0.4994258, %v342_v31  ;;  %v332_v41 = vadd.f32 0.18741608, %v331_v34  ;;  %v368_v58 = vadd.f32 0.0036580483, %v367_v18 }
 0x17b   :  { %v379_v2 = vadd.f32 0.014752088, %v378_v47 }
 0x17c   :  { %v344_v55 = vmul.f32 %v343_v32, %v324_v15  ;;  %v333_v22 = vmul.f32 %v332_v41, %v324_v15  ;;  %v369_v4 = vmul.f32 %v368_v58, %v1338_v8 }
 0x17d   :  { %v380_v11 = vmul.f32 %v379_v2, %v1338_v8 }
 0x17e   :  { %v345_v38 = vadd.f32 1.0, %v344_v55  ;;  %v334_v24 = vadd.f32 1.1283791, %v333_v22  ;;  %v370_v33 = vadd.f32 0.05243302, %v369_v4 }
 0x17f   :  { %v381_v7 = vadd.f32 0.112945676, %v380_v11 }
 0x180   :  { %886 = vrcp.f32 %v345_v38  ;;  %v357_v6 = vand.u32 2147483648, %v345_v38  ;;  %v355_v60 = vand.u32 2147483647, %v345_v38  ;;  %vm351_vm3 = vweird.f32 %v345_v38 }
 0x181   :  { %v382_v27 = vmul.f32 %v381_v7, %v1338_v8  ;;  %v335_v29 = vmul.f32 %v334_v24, %v321_v5  ;;  %v371_v5 = vmul.f32 %v370_v33, %v1338_v8 }
 0x182   :  { %v358_v10 = vor.u32 1.1754944e-38, %v357_v6  ;;  %vm356_vm5 = vcmp.eq.f32.partialorder %v355_v60, 8.507059e+37 }
 0x183   :  { %v383_v9 = vadd.f32 0.4994258, %v382_v27  ;;  %v372_v50 = vadd.f32 0.18741608, %v371_v5 }
 0x185   :  { %v384_v52 = vmul.f32 %v383_v9, %v1338_v8  ;;  %v373_v25 = vmul.f32 %v372_v50, %v1338_v8 }
 0x186   :  { %v887_v54 = vpop.eup %886 }
 0x187   :  { %v700_v59 = vpop.f32.mrf.mxu3  ;;  %v347_v53 = vmul.f32 %v887_v54, %v345_v38  ;;  %vm352_vm2 = vweird.f32 %v887_v54  ;;  %v385_v37 = vadd.f32 1.0, %v384_v52 }
 0x188   :  { %v1344_v26 = vadd.f32 %v700_v59, %v670_v61  ;;  %vm353_vm4 = vmor %vm351_vm3, %vm352_vm2  ;;  %v374_v59 = vadd.f32 1.1283791, %v373_v25 }
 0x189   :  { %v348_v1 = vsub.f32 1.0, %v347_v53  ;;  %888 = vrcp.f32 %v385_v37  ;;  %v397_v53 = vand.u32 2147483648, %v385_v37  ;;  %v395_v8 = vand.u32 2147483647, %v385_v37 }
 0x18a   :  { %v1349_v45 = vmul.f32 0.70710677, %v1344_v26  ;;  %vm391_vm7 = vweird.f32 %v385_v37 }
 0x18b   :  { %v349_v56 = vmul.f32 %v887_v54, %v348_v1  ;;  %v398_v60 = vor.u32 1.1754944e-38, %v397_v53  ;;  %vm396_vm10 = vcmp.eq.f32.partialorder %v395_v8, 8.507059e+37 }
 0x18c   :  { %v710_v42 = vmul.f32 %v1349_v45, %v1349_v45 }
 0x18d   :  { %v350_v62 = vadd.f32 %v887_v54, %v349_v56 }
 0x18e   :  { %v1354_v39 = vmin.f32 %v710_v42, 16.0 }
 0x18f   :  { %v703_v12 = vpop.f32.mrf.mxu3  ;;  %v354_v30 = vsel %vm353_vm4, %v887_v54, %v350_v62  ;;  %v889_v0 = vpop.eup %888  ;;  %v375_v62 = vmul.f32 %v374_v59, %v1334_v43 }
 0x190   :  { %v1356_v14 = vadd.f32 %v703_v12, %v675_v63  ;;  %v359_v48 = vsel %vm356_vm5, %v358_v10, %v354_v30  ;;  %v712_v13 = vmul.f32 2.1237322e-06, %v1354_v39  ;;  %v723_v15 = vmul.f32 3.8918573e-05, %v1354_v39 }
 0x191   :  { %v360_v16 = vmul.f32 %v359_v48, %v335_v29  ;;  %v387_v51 = vmul.f32 %v889_v0, %v385_v37  ;;  %vm392_vm6 = vweird.f32 %v889_v0 }
 0x192   :  { %v713_v23 = vadd.f32 0.00028619796, %v712_v13  ;;  %v724_v3 = vadd.f32 0.001143296, %v723_v15  ;;  %v1363_v57 = vmul.f32 0.70710677, %v1356_v14  ;;  %vm393_vm9 = vmor %vm391_vm7, %vm392_vm6 }
 0x193   :  { %v825_v36 = vclamps-f32 %v360_v16, 1.0  ;;  %v388_v61 = vsub.f32 1.0, %v387_v51  ;;  %v320_v15 = vmul.f32 0.5, %v1331_v44 }
 0x194   :  { %v714_v19 = vmul.f32 %v713_v23, %v1354_v39  ;;  %v725_v49 = vmul.f32 %v724_v3, %v1354_v39  ;;  %v750_v21 = vmul.f32 %v1363_v57, %v1363_v57 }
 0x195   :  { %v403_v35 = vadd.f32 1.0, %v825_v36  ;;  %v389_v1 = vmul.f32 %v889_v0, %v388_v61 }
 0x196   :  { %v1370_v31 = vmin.f32 %v750_v21, 16.0  ;;  %v726_v32 = vadd.f32 0.014752088, %v725_v49  ;;  %v715_v55 = vadd.f32 0.0036580483, %v714_v19 }
 0x197   :  { %v405_v20 = vmul.f32 %v403_v35, %v319_v28  ;;  %v390_v56 = vadd.f32 %v889_v0, %v389_v1 }
 0x198   :  { %v752_v17 = vmul.f32 2.1237322e-06, %v1370_v31  ;;  %v727_v34 = vmul.f32 %v726_v32, %v1354_v39  ;;  %v763_v38 = vmul.f32 3.8918573e-05, %v1370_v31  ;;  %v716_v18 = vmul.f32 %v715_v55, %v1354_v39 }
 0x199   :  { %407 = vst.msk [vmem:[#allocation2] sm:$0xff] %vm289_vm8, %v405_v20  ;;  %v394_v27 = vsel %vm393_vm9, %v889_v0, %v390_v56 }
 0x19a   :  { %v753_v40 = vadd.f32 0.00028619796, %v752_v17  ;;  %v728_v41 = vadd.f32 0.112945676, %v727_v34  ;;  %v764_v46 = vadd.f32 0.001143296, %v763_v38  ;;  %v399_v29 = vsel %vm396_vm10, %v398_v60, %v394_v27 }
 0x19b   :  { %v717_v11 = vadd.f32 0.05243302, %v716_v18  ;;  %v400_v33 = vmul.f32 %v399_v29, %v375_v62 }
 0x19c   :  { %v729_v47 = vmul.f32 %v728_v41, %v1354_v39  ;;  %v754_v54 = vmul.f32 %v753_v40, %v1370_v31  ;;  %v765_v22 = vmul.f32 %v764_v46, %v1370_v31  ;;  %v706_v41 = vmul.f32 0.5, %v1344_v26 }
 0x19d   :  { %v718_v63 = vmul.f32 %v717_v11, %v1354_v39  ;;  %v826_v30 = vclamps-f32 %v400_v33, 1.0 }
 0x19e   :  { %v730_v58 = vadd.f32 0.4994258, %v729_v47  ;;  %v766_v2 = vadd.f32 0.014752088, %v765_v22  ;;  %v755_v6 = vadd.f32 0.0036580483, %v754_v54 }
 0x19f   :  { %v719_v9 = vadd.f32 0.18741608, %v718_v63  ;;  %v404_v16 = vadd.f32 1.0, %v826_v30 }
 0x1a0   :  { %v731_v24 = vmul.f32 %v730_v58, %v1354_v39  ;;  %v767_v4 = vmul.f32 %v766_v2, %v1370_v31  ;;  %v756_v10 = vmul.f32 %v755_v6, %v1370_v31  ;;  %v707_v2 = vmul.f32 0.5, %v1356_v14 }
 0x1a1   :  { %v406_v5 = vmul.f32 %v404_v16, %v320_v15  ;;  %v720_v23 = vmul.f32 %v719_v9, %v1354_v39 }
 0x1a2   :  { %v732_v7 = vadd.f32 1.0, %v731_v24  ;;  %v768_v42 = vadd.f32 0.112945676, %v767_v4  ;;  %v757_v13 = vadd.f32 0.05243302, %v756_v10 }
 0x1a3   :  { %408 = vst.msk [vmem:[#allocation2 + $0x8] sm:$0xff] %vm289_vm8, %v406_v5  ;;  %v721_v21 = vadd.f32 1.1283791, %v720_v23 }
 0x1a4   :  { %890 = vrcp.f32 %v732_v7  ;;  %v769_v12 = vmul.f32 %v768_v42, %v1370_v31  ;;  %v758_v36 = vmul.f32 %v757_v13, %v1370_v31  ;;  %v744_v49 = vand.u32 2147483648, %v732_v7 }
 0x1a5   :  { %v742_v44 = vand.u32 2147483647, %v732_v7  ;;  %vm738_vm12 = vweird.f32 %v732_v7  ;;  %v722_v39 = vmul.f32 %v721_v21, %v1349_v45 }
 0x1a6   :  { %v770_v48 = vadd.f32 0.4994258, %v769_v12  ;;  %v759_v35 = vadd.f32 0.18741608, %v758_v36  ;;  %v745_v20 = vor.u32 1.1754944e-38, %v744_v49 }
 0x1a7   :  { %vm743_vm14 = vcmp.eq.f32.partialorder %v742_v44, 8.507059e+37 }
 0x1a8   :  { %v771_v43 = vmul.f32 %v770_v48, %v1370_v31  ;;  %v760_v34 = vmul.f32 %v759_v35, %v1370_v31 }
 0x1aa   :  { %v891_v52 = vpop.eup %890  ;;  %v772_v37 = vadd.f32 1.0, %v771_v43  ;;  %v761_v46 = vadd.f32 1.1283791, %v760_v34 }
 0x1ab   :  { %v734_v3 = vmul.f32 %v891_v52, %v732_v7  ;;  %vm739_vm11 = vweird.f32 %v891_v52 }
 0x1ac   :  { %892 = vrcp.f32 %v772_v37  ;;  %vm740_vm13 = vmor %vm738_vm12, %vm739_vm11  ;;  %v784_v51 = vand.u32 2147483648, %v772_v37  ;;  %v782_v54 = vand.u32 2147483647, %v772_v37  ;;  %vm778_vm0 = vweird.f32 %v772_v37 }
 0x1ad   :  { %v735_v19 = vsub.f32 1.0, %v734_v3  ;;  %v762_v31 = vmul.f32 %v761_v46, %v1363_v57 }
 0x1ae   :  { %v785_v59 = vor.u32 1.1754944e-38, %v784_v51  ;;  %vm783_vm2 = vcmp.eq.f32.partialorder %v782_v54, 8.507059e+37 }
 0x1af   :  { %v736_v28 = vmul.f32 %v891_v52, %v735_v19 }
 0x1b1   :  { %v737_v50 = vadd.f32 %v891_v52, %v736_v28 }
 0x1b2   :  { %v893_v55 = vpop.eup %892 }
 0x1b3   :  { %v741_v32 = vsel %vm740_vm13, %v891_v52, %v737_v50  ;;  %v774_v25 = vmul.f32 %v893_v55, %v772_v37  ;;  %vm779_vm15 = vweird.f32 %v893_v55 }
 0x1b4   :  { %v746_v17 = vsel %vm743_vm14, %v745_v20, %v741_v32  ;;  %vm780_vm1 = vmor %vm778_vm0, %vm779_vm15 }
 0x1b5   :  { %v747_v38 = vmul.f32 %v746_v17, %v722_v39  ;;  %v775_v0 = vsub.f32 1.0, %v774_v25 }
 0x1b7   :  { %v845_v40 = vclamps-f32 %v747_v38, 1.0  ;;  %v776_v47 = vmul.f32 %v893_v55, %v775_v0 }
 0x1b9   :  { %v790_v18 = vadd.f32 1.0, %v845_v40  ;;  %v777_v45 = vadd.f32 %v893_v55, %v776_v47 }
 0x1bb   :  { %v792_v22 = vmul.f32 %v790_v18, %v706_v41  ;;  %v781_v61 = vsel %vm780_vm1, %v893_v55, %v777_v45 }
 0x1bc   :  { %v786_v53 = vsel %vm783_vm2, %v785_v59, %v781_v61 }
 0x1bd   :  { %795 = vst.msk [vmem:[#allocation2 + $0x10] sm:$0xff] %vm289_vm8, %v792_v22  ;;  %v787_v58 = vmul.f32 %v786_v53, %v762_v31 }
 0x1bf   :  { %v846_v26 = vclamps-f32 %v787_v58, 1.0 }
 0x1c1   :  { %v791_v1 = vadd.f32 1.0, %v846_v26 }
 0x1c3   :  { %v793_v8 = vmul.f32 %v791_v1, %v707_v2 }
 0x1c5   :  { %796 = vst.msk [vmem:[#allocation2 + $0x18] sm:$0xff] %vm289_vm8, %v793_v8 }
 0x1c6   :  { %809 = dma.vmem_to_hbm [thread:$0]  %s802_s20, 512, %s804_s23, [#allocation3], %s922_s24, %s922_s24, %s923_s25  }
 0x1c7   :  { %918 = dma.done.wait [#allocation3], 512  }
 0x1c8   :  { %919 = vsyncadd [#allocation3], 4294966784 }
 0x1c9   :  { %814 = vsyncpa [#allocation3], 1 }

</bundles_post_ra>
